<compile_context>
chip_gen: v5e
topology: v5e:2x2
jax: 0.10.0
libtpu: 0.0.40
codegen_flags: <defaults>
</compile_context>

<pallas_src>
import functools

import jax
import jax.numpy as jnp
from jax.experimental import pallas as pl
from jax.experimental.pallas import tpu as pltpu


def _round_up(x, m):
    return ((x + m - 1) // m) * m


def _fused_residual_kernel(p_ref, w_ref, b_ref, o_ref, acc_ref):
    """One fused matmul per (row-tile, K-tile); epilogue on last K step."""
    k = pl.program_id(1)

    @pl.when(k == 0)
    def _():
        acc_ref[...] = jnp.zeros_like(acc_ref)

    acc_ref[...] += jnp.dot(p_ref[...], w_ref[...],
                            preferred_element_type=jnp.float32)

    @pl.when(k == pl.num_programs(1) - 1)
    def _():
        c_pad = o_ref.shape[-1]                 # static; multiple of 128
        r = acc_ref[...] + b_ref[...]           # (tm, 2*c_pad), f32
        conv = r[:, :c_pad]                     # lane-aligned split
        ident = r[:, c_pad:]
        o_ref[...] = (jnp.maximum(conv, 0.0) + ident).astype(o_ref.dtype)


def _im2col_nhwc(x_nhwc, kh, kw, sh, sw, ph, pw):
    n, h, w, c = x_nhwc.shape
    h_out = (h + 2 * ph - kh) // sh + 1
    w_out = (w + 2 * pw - kw) // sw + 1
    x_pad = jnp.pad(x_nhwc, ((0, 0), (ph, ph), (pw, pw), (0, 0)))
    cols = []
    for i in range(kh):
        for j in range(kw):
            cols.append(x_pad[:, i:i + sh * h_out:sh, j:j + sw * w_out:sw, :])
    patches = jnp.stack(cols, axis=3)                     # (N, Ho, Wo, KH*KW, C)
    patches = patches.reshape(n * h_out * w_out, kh * kw * c)
    return patches, h_out, w_out


@functools.partial(jax.jit,
                   static_argnames=("kernel_size", "stride", "padding", "tm", "tk"))
def residual_down_block(x_nchw, w_conv, b_conv, w_proj, b_proj,
                        kernel_size, stride, padding, tm=512, tk=512):
    kh, kw = kernel_size
    sh, sw = stride
    ph, pw = padding
    n, c_in, h, w = x_nchw.shape
    c_out = w_conv.shape[0]

    compute_dtype = jnp.bfloat16   # MXU-fast path on v6e/v7x; f32 accumulate

    # ---- patches (im2col, NHWC, flatten order (kh, kw, c_in)) --------------
    x_nhwc = jnp.transpose(x_nchw, (0, 2, 3, 1)).astype(compute_dtype)
    patches, h_out, w_out = _im2col_nhwc(x_nhwc, kh, kw, sh, sw, ph, pw)
    m, kkc = patches.shape

    # ---- fused weight [conv | pooled-proj], each half padded to 128 lanes --
    c_pad = _round_up(c_out, 128)
    wc_mat = jnp.transpose(w_conv, (2, 3, 1, 0)).reshape(kkc, c_out)
    w_proj2 = w_proj[:, :, 0, 0].T                                  # (C_in, C_out)
    wpp_mat = jnp.tile(w_proj2[None], (kh * kw, 1, 1)).reshape(kkc, c_out)
    wpp_mat = wpp_mat / float(kh * kw)       # count_include_pad=True avg pool

    wc_mat = jnp.pad(wc_mat.astype(jnp.float32), ((0, 0), (0, c_pad - c_out)))
    wpp_mat = jnp.pad(wpp_mat.astype(jnp.float32), ((0, 0), (0, c_pad - c_out)))
    w_fused = jnp.concatenate([wc_mat, wpp_mat], axis=1)            # (KKC, 2*c_pad)

    bc = jnp.pad(b_conv.astype(jnp.float32), (0, c_pad - c_out))
    bp = jnp.pad(b_proj.astype(jnp.float32), (0, c_pad - c_out))
    b_fused = jnp.concatenate([bc, bp]).reshape(1, 2 * c_pad)       # f32 bias

    # ---- tiling -------------------------------------------------------------
    tk = min(tk, _round_up(kkc, 128))        # contraction tile, lane multiple
    tm = min(tm, _round_up(m, 8))            # row tile, sublane multiple

    kkc_pad = _round_up(kkc, tk)
    m_pad = _round_up(m, tm)

    patches = jnp.pad(patches, ((0, m_pad - m), (0, kkc_pad - kkc)))
    w_fused = jnp.pad(w_fused, ((0, kkc_pad - kkc), (0, 0))).astype(compute_dtype)

    grid = (m_pad // tm, kkc_pad // tk)

    # Rough scoped-VMEM need (double-buffered inputs/outputs + accumulator);
    # keep within every generation's budget (v5e 16 MiB default -> raise to 32).
    vmem_bytes = (2 * tm * tk * 2 +                 # patch tiles (bf16, 2 bufs)
                  2 * tk * 2 * c_pad * 2 +          # weight tiles (bf16, 2 bufs)
                  2 * 2 * c_pad * 4 +               # bias
                  2 * tm * c_pad * 4 +              # output tiles (f32, 2 bufs)
                  tm * 2 * c_pad * 4)               # f32 accumulator scratch
    vmem_limit = int(min(48 * 1024 * 1024, max(32 * 1024 * 1024, 2 * vmem_bytes)))

    out = pl.pallas_call(
        _fused_residual_kernel,
        out_shape=jax.ShapeDtypeStruct((m_pad, c_pad), jnp.float32),
        grid_spec=pltpu.PrefetchScalarGridSpec(
            num_scalar_prefetch=0,
            grid=grid,
            in_specs=[
                pl.BlockSpec((tm, tk), lambda i, k: (i, k)),           # patches
                pl.BlockSpec((tk, 2 * c_pad), lambda i, k: (k, 0)),    # fused W
                pl.BlockSpec((1, 2 * c_pad), lambda i, k: (0, 0)),     # fused bias
            ],
            out_specs=pl.BlockSpec((tm, c_pad), lambda i, k: (i, 0)),
            scratch_shapes=[pltpu.VMEM((tm, 2 * c_pad), jnp.float32)],
        ),
        compiler_params=pltpu.CompilerParams(
            dimension_semantics=("parallel", "arbitrary"),
            vmem_limit_bytes=vmem_limit,
        ),
    )(patches, w_fused, b_fused)

    out = out[:m, :c_out].reshape(n, h_out, w_out, c_out)
    return jnp.transpose(out, (0, 3, 1, 2))                          # back to NCHW


def _reference(x, w_conv, b_conv, w_proj, b_proj, k, s, p):
    conv = jax.lax.conv_general_dilated(
        x, w_conv, window_strides=(s, s), padding=[(p, p), (p, p)],
        dimension_numbers=('NCHW', 'OIHW', 'NCHW'),
        precision=jax.lax.Precision.HIGHEST)
    conv = jnp.maximum(conv + b_conv[None, :, None, None], 0.0)
    pooled = jax.lax.reduce_window(
        x, 0.0, jax.lax.add, (1, 1, k, k), (1, 1, s, s),
        [(0, 0), (0, 0), (p, p), (p, p)]) / float(k * k)
    ident = jax.lax.conv_general_dilated(
        pooled, w_proj, (1, 1), [(0, 0), (0, 0)],
        dimension_numbers=('NCHW', 'OIHW', 'NCHW'),
        precision=jax.lax.Precision.HIGHEST)
    ident = ident + b_proj[None, :, None, None]
    return conv + ident


if __name__ == "__main__":
    # Module config (small, consistent with the PyTorch module)
    N, C_IN, C_OUT, H, W = 2, 4, 8, 16, 16
    K, S, P = 3, 2, 1

    key = jax.random.PRNGKey(0)
    k1, k2, k3, k4, k5 = jax.random.split(key, 5)

    x = jax.random.normal(k1, (N, C_IN, H, W), dtype=jnp.float32)
    w_conv = 0.1 * jax.random.normal(k2, (C_OUT, C_IN, K, K), dtype=jnp.float32)
    b_conv = 0.1 * jax.random.normal(k3, (C_OUT,), dtype=jnp.float32)
    w_proj = 0.1 * jax.random.normal(k4, (C_OUT, C_IN, 1, 1), dtype=jnp.float32)
    b_proj = 0.1 * jax.random.normal(k5, (C_OUT,), dtype=jnp.float32)

    out = residual_down_block(x, w_conv, b_conv, w_proj, b_proj,
                              kernel_size=(K, K), stride=(S, S), padding=(P, P))
    out = jax.block_until_ready(out)

    ref = jax.block_until_ready(_reference(x, w_conv, b_conv, w_proj, b_proj, K, S, P))
    assert out.shape == ref.shape, (out.shape, ref.shape)
    err = float(jnp.max(jnp.abs(out - ref)))
    # bf16 operands on the MXU (f32 accumulate) -> loosened tolerance.
    assert err < 5e-2, err

    print("KERNEL_OK")
</pallas_src>

<mosaic_0001>
module attributes {stable_mosaic.version = 11 : i64} {
  func.func @_fused_residual_kernel(%arg0: i32, %arg1: i32, %arg2: memref<128x128xbf16, #tpu.memory_space<vmem>>, %arg3: memref<128x256xbf16, #tpu.memory_space<vmem>>, %arg4: memref<1x256xf32, #tpu.memory_space<vmem>>, %arg5: memref<128x128xf32, #tpu.memory_space<vmem>>, %arg6: memref<128x256xf32, #tpu.memory_space<vmem>>) attributes {dimension_semantics = [#tpu.dimension_semantics<parallel>, #tpu.dimension_semantics<arbitrary>], iteration_bounds = array<i64: 1, 1>, scalar_prefetch = 0 : i64, scratch_operands = 1 : i64, tpu.core_type = #tpu.core_type<tc>, window_params = [{transform_indices = @transform_0, window_bounds = array<i64: 128, 128>}, {transform_indices = @transform_1, window_bounds = array<i64: 128, 256>}, {pipeline_mode = #tpu.pipeline_mode<synchronous>, transform_indices = @transform_2, window_bounds = array<i64: 1, 256>}, {transform_indices = @transform_3, window_bounds = array<i64: 128, 128>}]} {
    %c0_i32 = arith.constant 0 : i32
    %0 = arith.cmpi eq, %arg1, %c0_i32 : i32
    %1 = arith.extui %0 : i1 to i32
    %c0_i32_0 = arith.constant 0 : i32
    %2 = arith.cmpi ne, %1, %c0_i32_0 : i32
    scf.if %2 {
      %cst_10 = arith.constant 0.000000e+00 : f32
      %12 = vector.broadcast %cst_10 : f32 to vector<128x256xf32>
      %c0_11 = arith.constant 0 : index
      %c0_12 = arith.constant 0 : index
      %13 = vector.load %arg6[%c0_11, %c0_12] : memref<128x256xf32, #tpu.memory_space<vmem>>, vector<128x256xf32>
      tpu.vector_store %arg6[%c0_11, %c0_12], %12 {strides = array<i32>} : memref<128x256xf32, #tpu.memory_space<vmem>>, vector<128x256xf32>,
    } else {
    }
    %c0 = arith.constant 0 : index
    %c0_1 = arith.constant 0 : index
    %3 = vector.load %arg6[%c0, %c0_1] : memref<128x256xf32, #tpu.memory_space<vmem>>, vector<128x256xf32>
    %c0_2 = arith.constant 0 : index
    %c0_3 = arith.constant 0 : index
    %4 = vector.load %arg2[%c0_2, %c0_3] : memref<128x128xbf16, #tpu.memory_space<vmem>>, vector<128x128xbf16>
    %c0_4 = arith.constant 0 : index
    %c0_5 = arith.constant 0 : index
    %5 = vector.load %arg3[%c0_4, %c0_5] : memref<128x256xbf16, #tpu.memory_space<vmem>>, vector<128x256xbf16>
    %cst = arith.constant dense<0.000000e+00> : vector<128x256xf32>
    %6 = tpu.matmul %4, %5, %cst {dimension_numbers = #tpu.dot_dimension_numbers<[1], [0], [0], [1], [0, 0, 1, 1], [], []>} : vector<128x128xbf16>, vector<128x256xbf16>, vector<128x256xf32> -> vector<128x256xf32>
    %7 = arith.addf %3, %6 : vector<128x256xf32>
    %c0_6 = arith.constant 0 : index
    %c0_7 = arith.constant 0 : index
    %8 = vector.load %arg6[%c0_6, %c0_7] : memref<128x256xf32, #tpu.memory_space<vmem>>, vector<128x256xf32>
    tpu.vector_store %arg6[%c0_6, %c0_7], %7 {strides = array<i32>} : memref<128x256xf32, #tpu.memory_space<vmem>>, vector<128x256xf32>,
    %c0_i32_8 = arith.constant 0 : i32
    %9 = arith.cmpi eq, %arg1, %c0_i32_8 : i32
    %10 = arith.extui %9 : i1 to i32
    %c0_i32_9 = arith.constant 0 : i32
    %11 = arith.cmpi ne, %10, %c0_i32_9 : i32
    scf.if %11 {
      %c0_10 = arith.constant 0 : index
      %c0_11 = arith.constant 0 : index
      %12 = vector.load %arg6[%c0_10, %c0_11] : memref<128x256xf32, #tpu.memory_space<vmem>>, vector<128x256xf32>
      %c0_12 = arith.constant 0 : index
      %c0_13 = arith.constant 0 : index
      %13 = vector.load %arg4[%c0_12, %c0_13] : memref<1x256xf32, #tpu.memory_space<vmem>>, vector<1x256xf32>
      %14 = vector.broadcast %13 : vector<1x256xf32> to vector<128x256xf32>
      %15 = arith.addf %12, %14 : vector<128x256xf32>
      %16 = vector.extract_strided_slice %15 {offsets = [0, 0], sizes = [128, 128], strides = [1, 1]} : vector<128x256xf32> to vector<128x128xf32>
      %17 = vector.extract_strided_slice %15 {offsets = [0, 128], sizes = [128, 128], strides = [1, 1]} : vector<128x256xf32> to vector<128x128xf32>
      %cst_14 = arith.constant 0.000000e+00 : f32
      %18 = vector.broadcast %cst_14 : f32 to vector<128x128xf32>
      %19 = arith.maximumf %16, %18 : vector<128x128xf32>
      %20 = arith.addf %19, %17 : vector<128x128xf32>
      %c0_15 = arith.constant 0 : index
      %c0_16 = arith.constant 0 : index
      %21 = vector.load %arg5[%c0_15, %c0_16] : memref<128x128xf32, #tpu.memory_space<vmem>>, vector<128x128xf32>
      tpu.vector_store %arg5[%c0_15, %c0_16], %20 {strides = array<i32>} : memref<128x128xf32, #tpu.memory_space<vmem>>, vector<128x128xf32>,
    } else {
    }
    return
  }
  func.func @transform_0(%arg0: i32, %arg1: i32) -> (i32, i32) {
    %c0_i32 = arith.constant 0 : i32
    return %arg0, %arg1 : i32, i32
  }
  func.func @transform_1(%arg0: i32, %arg1: i32) -> (i32, i32) {
    %c0_i32 = arith.constant 0 : i32
    %c0_i32_0 = arith.constant 0 : i32
    return %arg1, %c0_i32 : i32, i32
  }
  func.func @transform_2(%arg0: i32, %arg1: i32) -> (i32, i32) {
    %c0_i32 = arith.constant 0 : i32
    %c0_i32_0 = arith.constant 0 : i32
    %c0_i32_1 = arith.constant 0 : i32
    return %c0_i32, %c0_i32_0 : i32, i32
  }
  func.func @transform_3(%arg0: i32, %arg1: i32) -> (i32, i32) {
    %c0_i32 = arith.constant 0 : i32
    %c0_i32_0 = arith.constant 0 : i32
    return %arg0, %c0_i32 : i32, i32
  }
}

</mosaic_0001>

<bundles_post_ra>
// kernel: residual_down_block.1
= control target key start
LH: loop header
LB: loop body
LE: loop exit
PB: predicated region body
PF: predicated region fallthrough
CT: control target
= control target key end

     0   :  { %s892_s1 = inlined_call_operand.vmem [shape: bf16[128,256], index: 1, kind: input, shape index: {}]   ;;  %s893_s0 = inlined_call_operand.vmem [shape: bf16[128,128], index: 0, kind: input, shape index: {}]   ;;  %s894_s2 = inlined_call_operand.vmem [shape: f32[1,256], index: 2, kind: input, shape index: {}]   ;;  %s895_s3 = inlined_call_operand.vmem [shape: f32[128,128], index: 3, kind: output, shape index: {}]  }
   0x1   :  { %v619_v0 = vld [vmem:[%s892_s1 + $0x70] sm:$0xf]  ;;  %v648_v1 = vld [vmem:[%s892_s1 + $0x74] sm:$0xf0]  ;;  %v647_v2 = vld [vmem:[%s892_s1 + $0x74] sm:$0xf] }
   0x2   :  { %v620_v3 = vor.u32 %v648_v1, %v619_v0  ;;  %v621_v4 = vld [vmem:[%s892_s1 + $0x78] sm:$0xf0]  ;;  %v611_v5 = vld [vmem:[%s892_s1 + $0x60] sm:$0xf]  ;;  %v646_v6 = vld [vmem:[%s892_s1 + $0x64] sm:$0xf0] }
   0x3   :  { %v624_v7 = vor.u32 %v647_v2, %v621_v4  ;;  %v645_v8 = vld [vmem:[%s892_s1 + $0x64] sm:$0xf]  ;;  %v613_v9 = vld [vmem:[%s892_s1 + $0x68] sm:$0xf0]  ;;  %v612_v10 = vor.u32 %v646_v6, %v611_v5  ;;  %v603_v12 = vld [vmem:[%s892_s1 + $0x50] sm:$0xf] }
   0x4   :  { %242 = vmatpush.bf16.msra.mxu0 %v620_v3  ;;  %649 = vmatpush.bf16.msra.mxu2 %v620_v3  ;;  %v616_v11 = vor.u32 %v645_v8, %v613_v9  ;;  %v644_v13 = vld [vmem:[%s892_s1 + $0x54] sm:$0xf0]  ;;  %v643_v14 = vld [vmem:[%s892_s1 + $0x54] sm:$0xf]  ;;  %v605_v15 = vld [vmem:[%s892_s1 + $0x58] sm:$0xf0] }
   0x5   :  { %291 = vmatpush.bf16.msra.mxu1 %v624_v7  ;;  %657 = vmatpush.bf16.msra.mxu3 %v624_v7  ;;  %v604_v16 = vor.u32 %v644_v13, %v603_v12  ;;  %v608_v17 = vor.u32 %v643_v14, %v605_v15  ;;  %v595_v18 = vld [vmem:[%s892_s1 + $0x40] sm:$0xf]  ;;  %v642_v19 = vld [vmem:[%s892_s1 + $0x44] sm:$0xf0]  ;;  %v641_v20 = vld [vmem:[%s892_s1 + $0x44] sm:$0xf] }
   0x6   :  { %v597_v21 = vld [vmem:[%s892_s1 + $0x48] sm:$0xf0]  ;;  %v596_v22 = vor.u32 %v642_v19, %v595_v18  ;;  %v587_v24 = vld [vmem:[%s892_s1 + $0x30] sm:$0xf]  ;;  %v640_v25 = vld [vmem:[%s892_s1 + $0x34] sm:$0xf0] }
   0x7   :  { %v600_v23 = vor.u32 %v641_v20, %v597_v21  ;;  %v639_v26 = vld [vmem:[%s892_s1 + $0x34] sm:$0xf]  ;;  %v589_v27 = vld [vmem:[%s892_s1 + $0x38] sm:$0xf0]  ;;  %v588_v28 = vor.u32 %v640_v25, %v587_v24  ;;  %v579_v30 = vld [vmem:[%s892_s1 + $0x20] sm:$0xf] }
   0x8   :  { %243 = vmatpush.bf16.msra.mxu0 %v612_v10  ;;  %650 = vmatpush.bf16.msra.mxu2 %v612_v10  ;;  %v592_v29 = vor.u32 %v639_v26, %v589_v27  ;;  %v638_v31 = vld [vmem:[%s892_s1 + $0x24] sm:$0xf0]  ;;  %v637_v32 = vld [vmem:[%s892_s1 + $0x24] sm:$0xf]  ;;  %v581_v33 = vld [vmem:[%s892_s1 + $0x28] sm:$0xf0] }
   0x9   :  { %292 = vmatpush.bf16.msra.mxu1 %v616_v11  ;;  %658 = vmatpush.bf16.msra.mxu3 %v616_v11  ;;  %v580_v34 = vor.u32 %v638_v31, %v579_v30  ;;  %v584_v35 = vor.u32 %v637_v32, %v581_v33  ;;  %v571_v36 = vld [vmem:[%s892_s1 + $0x10] sm:$0xf]  ;;  %v636_v37 = vld [vmem:[%s892_s1 + $0x14] sm:$0xf0]  ;;  %v635_v38 = vld [vmem:[%s892_s1 + $0x14] sm:$0xf] }
   0xa   :  { %v573_v39 = vld [vmem:[%s892_s1 + $0x18] sm:$0xf0]  ;;  %v572_v40 = vor.u32 %v636_v37, %v571_v36  ;;  %v563_v42 = vld [vmem:[%s892_s1] sm:$0xf]  ;;  %v634_v43 = vld [vmem:[%s892_s1 + $0x4] sm:$0xf0] }
   0xb   :  { %v576_v41 = vor.u32 %v635_v38, %v573_v39  ;;  %v633_v44 = vld [vmem:[%s892_s1 + $0x4] sm:$0xf]  ;;  %v565_v45 = vld [vmem:[%s892_s1 + $0x8] sm:$0xf0]  ;;  %v564_v46 = vor.u32 %v634_v43, %v563_v42  ;;  %v627_v52 = vld [vmem:[%s893_s0 + $0x10] sm:$0xff] }
   0xc   :  { %244 = vmatpush.bf16.msra.mxu0 %v604_v16  ;;  %651 = vmatpush.bf16.msra.mxu2 %v604_v16  ;;  %v568_v47 = vor.u32 %v633_v44, %v565_v45  ;;  %v625_v48 = vld [vmem:[%s893_s0] sm:$0xff]  ;;  %v626_v50 = vld [vmem:[%s893_s0 + $0x8] sm:$0xff]  ;;  %v631_v53 = vld [vmem:[%s893_s0 + $0x30] sm:$0xff] }
   0xd   :  { %293 = vmatpush.bf16.msra.mxu1 %v608_v17  ;;  %659 = vmatpush.bf16.msra.mxu3 %v608_v17  ;;  %v629_v49 = vld [vmem:[%s893_s0 + $0x20] sm:$0xff]  ;;  %v630_v51 = vld [vmem:[%s893_s0 + $0x28] sm:$0xff]  ;;  %v628_v54 = vld [vmem:[%s893_s0 + $0x18] sm:$0xff] }
   0xe   :  { %v632_v55 = vld [vmem:[%s893_s0 + $0x38] sm:$0xff]  ;;  %v439_v56 = vld [vmem:[%s894_s2] sm:$0x3] }
   0xf   :  { %v808_v57 = vperm.slane %v439_v56, 0  ;;  %v810_v58 = vperm.slane %v439_v56, 1 }
  0x10   :  { %245 = vmatpush.bf16.msra.mxu0 %v596_v22  ;;  %652 = vmatpush.bf16.msra.mxu2 %v596_v22 }
  0x11   :  { %294 = vmatpush.bf16.msra.mxu1 %v600_v23  ;;  %660 = vmatpush.bf16.msra.mxu3 %v600_v23 }
  0x14   :  { %246 = vmatpush.bf16.msra.mxu0 %v588_v28  ;;  %653 = vmatpush.bf16.msra.mxu2 %v588_v28 }
  0x15   :  { %295 = vmatpush.bf16.msra.mxu1 %v592_v29  ;;  %661 = vmatpush.bf16.msra.mxu3 %v592_v29 }
  0x18   :  { %247 = vmatpush.bf16.msra.mxu0 %v580_v34  ;;  %654 = vmatpush.bf16.msra.mxu2 %v580_v34 }
  0x19   :  { %296 = vmatpush.bf16.msra.mxu1 %v584_v35  ;;  %662 = vmatpush.bf16.msra.mxu3 %v584_v35 }
  0x1c   :  { %248 = vmatpush.bf16.msra.mxu0 %v572_v40  ;;  %655 = vmatpush.bf16.msra.mxu2 %v572_v40 }
  0x1d   :  { %297 = vmatpush.bf16.msra.mxu1 %v576_v41  ;;  %663 = vmatpush.bf16.msra.mxu3 %v576_v41 }
  0x20   :  { %249 = vmatpush.bf16.msra.mxu0 %v564_v46  ;;  %656 = vmatpush.bf16.msra.mxu2 %v564_v46 }
  0x21   :  { %298 = vmatpush.bf16.msra.mxu1 %v568_v47  ;;  %664 = vmatpush.bf16.msra.mxu3 %v568_v47 }
  0x23   :  { %250 = vmatmul.bf16.vlgmr.msra.gmra.mxu0 %v625_v48  ;;  %270 = vmatmul.bf16.vlgmr.msra.gmra.mxu2 %v629_v49 }
  0x24   :  { %299 = vmatmul.bf16.vlgmr.msra.gmra.mxu1 %v625_v48  ;;  %319 = vmatmul.bf16.vlgmr.msra.gmra.mxu3 %v629_v49 }
  0x33   :  { %255 = vmatmul.bf16.gmra.mxu0 %v626_v50  ;;  %275 = vmatmul.bf16.gmra.mxu2 %v630_v51 }
  0x34   :  { %304 = vmatmul.bf16.gmra.mxu1 %v626_v50  ;;  %324 = vmatmul.bf16.gmra.mxu3 %v630_v51 }
  0x43   :  { %260 = vmatmul.bf16.gmra.mxu0 %v627_v52  ;;  %280 = vmatmul.bf16.gmra.mxu2 %v631_v53 }
  0x44   :  { %309 = vmatmul.bf16.gmra.mxu1 %v627_v52  ;;  %329 = vmatmul.bf16.gmra.mxu3 %v631_v53 }
  0x53   :  { %265 = vmatmul.bf16.gmra.mxu0 %v628_v54  ;;  %285 = vmatmul.bf16.gmra.mxu2 %v632_v55 }
  0x54   :  { %314 = vmatmul.bf16.gmra.mxu1 %v628_v54  ;;  %334 = vmatmul.bf16.gmra.mxu3 %v632_v55 }
  0xa0   :  { %v251_v59 = vpop.f32.mrf.mxu0 }
  0xa1   :  { %v445_v60 = vadd.f32 %v808_v57, %v251_v59  ;;  %v300_v61 = vpop.f32.mrf.mxu1 }
  0xa2   :  { %v446_v62 = vadd.f32 %v810_v58, %v300_v61 }
  0xa3   :  { %v477_v63 = vmax.f32 %v445_v60, 0.0 }
  0xa5   :  { %v493_v0 = vadd.f32 %v477_v63, %v446_v62 }
  0xa6   :  { %v271_v1 = vpop.f32.mrf.mxu2 }
  0xa7   :  { %509 = vst [vmem:[%s895_s3] sm:$0xff] %v493_v0  ;;  %v461_v2 = vadd.f32 %v808_v57, %v271_v1  ;;  %v320_v3 = vpop.f32.mrf.mxu3 }
  0xa8   :  { %v462_v4 = vadd.f32 %v810_v58, %v320_v3  ;;  %v253_v5 = vpop.f32.mrf.mxu0 }
  0xa9   :  { %v485_v6 = vmax.f32 %v461_v2, 0.0  ;;  %v447_v7 = vadd.f32 %v808_v57, %v253_v5  ;;  %v302_v8 = vpop.f32.mrf.mxu1 }
  0xaa   :  { %v448_v11 = vadd.f32 %v810_v58, %v302_v8 }
  0xab   :  { %v501_v9 = vadd.f32 %v485_v6, %v462_v4  ;;  %v478_v10 = vmax.f32 %v447_v7, 0.0 }
  0xad   :  { %517 = vst [vmem:[%s895_s3 + $0x40] sm:$0xff] %v501_v9  ;;  %v494_v12 = vadd.f32 %v478_v10, %v448_v11 }
  0xae   :  { %v273_v13 = vpop.f32.mrf.mxu2 }
  0xaf   :  { %510 = vst [vmem:[%s895_s3 + $0x8] sm:$0xff] %v494_v12  ;;  %v463_v14 = vadd.f32 %v808_v57, %v273_v13  ;;  %v322_v15 = vpop.f32.mrf.mxu3 }
  0xb0   :  { %v256_v16 = vpop.f32.mrf.mxu0  ;;  %v464_v18 = vadd.f32 %v810_v58, %v322_v15 }
  0xb1   :  { %v486_v17 = vmax.f32 %v463_v14, 0.0  ;;  %v449_v19 = vadd.f32 %v808_v57, %v256_v16  ;;  %v305_v20 = vpop.f32.mrf.mxu1 }
  0xb2   :  { %v450_v21 = vadd.f32 %v810_v58, %v305_v20 }
  0xb3   :  { %v502_v22 = vadd.f32 %v486_v17, %v464_v18  ;;  %v479_v23 = vmax.f32 %v449_v19, 0.0 }
  0xb5   :  { %518 = vst [vmem:[%s895_s3 + $0x48] sm:$0xff] %v502_v22  ;;  %v495_v24 = vadd.f32 %v479_v23, %v450_v21 }
  0xb6   :  { %v276_v25 = vpop.f32.mrf.mxu2 }
  0xb7   :  { %511 = vst [vmem:[%s895_s3 + $0x10] sm:$0xff] %v495_v24  ;;  %v465_v26 = vadd.f32 %v808_v57, %v276_v25  ;;  %v325_v27 = vpop.f32.mrf.mxu3 }
  0xb8   :  { %v466_v28 = vadd.f32 %v810_v58, %v325_v27  ;;  %v258_v29 = vpop.f32.mrf.mxu0 }
  0xb9   :  { %v487_v30 = vmax.f32 %v465_v26, 0.0  ;;  %v451_v31 = vadd.f32 %v808_v57, %v258_v29  ;;  %v307_v32 = vpop.f32.mrf.mxu1 }
  0xba   :  { %v452_v35 = vadd.f32 %v810_v58, %v307_v32 }
  0xbb   :  { %v503_v33 = vadd.f32 %v487_v30, %v466_v28  ;;  %v480_v34 = vmax.f32 %v451_v31, 0.0 }
  0xbd   :  { %519 = vst [vmem:[%s895_s3 + $0x50] sm:$0xff] %v503_v33  ;;  %v496_v36 = vadd.f32 %v480_v34, %v452_v35 }
  0xbe   :  { %v278_v37 = vpop.f32.mrf.mxu2 }
  0xbf   :  { %512 = vst [vmem:[%s895_s3 + $0x18] sm:$0xff] %v496_v36  ;;  %v467_v38 = vadd.f32 %v808_v57, %v278_v37  ;;  %v327_v39 = vpop.f32.mrf.mxu3 }
  0xc0   :  { %v261_v40 = vpop.f32.mrf.mxu0  ;;  %v468_v42 = vadd.f32 %v810_v58, %v327_v39 }
  0xc1   :  { %v488_v41 = vmax.f32 %v467_v38, 0.0  ;;  %v453_v43 = vadd.f32 %v808_v57, %v261_v40  ;;  %v310_v44 = vpop.f32.mrf.mxu1 }
  0xc2   :  { %v454_v45 = vadd.f32 %v810_v58, %v310_v44 }
  0xc3   :  { %v504_v46 = vadd.f32 %v488_v41, %v468_v42  ;;  %v481_v47 = vmax.f32 %v453_v43, 0.0 }
  0xc5   :  { %520 = vst [vmem:[%s895_s3 + $0x58] sm:$0xff] %v504_v46  ;;  %v497_v48 = vadd.f32 %v481_v47, %v454_v45 }
  0xc6   :  { %v281_v49 = vpop.f32.mrf.mxu2 }
  0xc7   :  { %513 = vst [vmem:[%s895_s3 + $0x20] sm:$0xff] %v497_v48  ;;  %v469_v50 = vadd.f32 %v808_v57, %v281_v49  ;;  %v330_v51 = vpop.f32.mrf.mxu3 }
  0xc8   :  { %v470_v52 = vadd.f32 %v810_v58, %v330_v51  ;;  %v263_v53 = vpop.f32.mrf.mxu0 }
  0xc9   :  { %v489_v54 = vmax.f32 %v469_v50, 0.0  ;;  %v455_v55 = vadd.f32 %v808_v57, %v263_v53  ;;  %v312_v56 = vpop.f32.mrf.mxu1 }
  0xca   :  { %v456_v61 = vadd.f32 %v810_v58, %v312_v56 }
  0xcb   :  { %v505_v59 = vadd.f32 %v489_v54, %v470_v52  ;;  %v482_v60 = vmax.f32 %v455_v55, 0.0 }
  0xcd   :  { %521 = vst [vmem:[%s895_s3 + $0x60] sm:$0xff] %v505_v59  ;;  %v498_v62 = vadd.f32 %v482_v60, %v456_v61 }
  0xce   :  { %v283_v63 = vpop.f32.mrf.mxu2 }
  0xcf   :  { %514 = vst [vmem:[%s895_s3 + $0x28] sm:$0xff] %v498_v62  ;;  %v471_v0 = vadd.f32 %v808_v57, %v283_v63  ;;  %v332_v1 = vpop.f32.mrf.mxu3 }
  0xd0   :  { %v266_v2 = vpop.f32.mrf.mxu0  ;;  %v472_v4 = vadd.f32 %v810_v58, %v332_v1 }
  0xd1   :  { %v490_v3 = vmax.f32 %v471_v0, 0.0  ;;  %v457_v5 = vadd.f32 %v808_v57, %v266_v2  ;;  %v315_v6 = vpop.f32.mrf.mxu1 }
  0xd2   :  { %v458_v7 = vadd.f32 %v810_v58, %v315_v6 }
  0xd3   :  { %v506_v8 = vadd.f32 %v490_v3, %v472_v4  ;;  %v483_v9 = vmax.f32 %v457_v5, 0.0 }
  0xd5   :  { %522 = vst [vmem:[%s895_s3 + $0x68] sm:$0xff] %v506_v8  ;;  %v499_v10 = vadd.f32 %v483_v9, %v458_v7 }
  0xd6   :  { %v286_v11 = vpop.f32.mrf.mxu2 }
  0xd7   :  { %515 = vst [vmem:[%s895_s3 + $0x30] sm:$0xff] %v499_v10  ;;  %v473_v12 = vadd.f32 %v808_v57, %v286_v11  ;;  %v335_v13 = vpop.f32.mrf.mxu3 }
  0xd8   :  { %v474_v14 = vadd.f32 %v810_v58, %v335_v13  ;;  %v268_v15 = vpop.f32.mrf.mxu0 }
  0xd9   :  { %v491_v16 = vmax.f32 %v473_v12, 0.0  ;;  %v459_v17 = vadd.f32 %v808_v57, %v268_v15  ;;  %v317_v18 = vpop.f32.mrf.mxu1 }
  0xda   :  { %v460_v21 = vadd.f32 %v810_v58, %v317_v18 }
  0xdb   :  { %v507_v19 = vadd.f32 %v491_v16, %v474_v14  ;;  %v484_v20 = vmax.f32 %v459_v17, 0.0 }
  0xdd   :  { %523 = vst [vmem:[%s895_s3 + $0x70] sm:$0xff] %v507_v19  ;;  %v500_v22 = vadd.f32 %v484_v20, %v460_v21 }
  0xde   :  { %v288_v23 = vpop.f32.mrf.mxu2 }
  0xdf   :  { %516 = vst [vmem:[%s895_s3 + $0x38] sm:$0xff] %v500_v22  ;;  %v475_v24 = vadd.f32 %v808_v57, %v288_v23  ;;  %v337_v25 = vpop.f32.mrf.mxu3 }
  0xe0   :  { %v476_v27 = vadd.f32 %v810_v58, %v337_v25 }
  0xe1   :  { %v492_v26 = vmax.f32 %v475_v24, 0.0 }
  0xe3   :  { %v508_v28 = vadd.f32 %v492_v26, %v476_v27 }
  0xe5   :  { %524 = vst [vmem:[%s895_s3 + $0x78] sm:$0xff] %v508_v28 }

</bundles_post_ra>
